<compile_context>
chip_gen: v5e
topology: v5e:2x2
jax: 0.10.0
libtpu: 0.0.40
codegen_flags: <defaults>
</compile_context>

<pallas_src>
import jax
import jax.numpy as jnp
from jax.experimental import pallas as pl
from jax.experimental.pallas import tpu as pltpu

EPS = 1e-5

# Configuration consistent with the module's __init__.
BATCH = 8
N_CLASSES = 4
N_CHANNELS = 4                      # unused in forward (kept for fidelity)
N_CHANNELS_CLASS = [32, 16]
N_CHANNELS_CONCAT = [32, 16]
MD_DIM = 6                          # implied by Linear(n_channels_class[-1] + 6, ...)

Z_DIM = N_CHANNELS_CLASS[0]         # 32
C_OUT = N_CHANNELS_CLASS[1]         # 16
F_OUT = N_CHANNELS_CONCAT[0]        # 32
CC_OUT = N_CHANNELS_CONCAT[1]       # 16
HEAD = N_CLASSES - 1                # 3

LANES = 128                         # lane-padded last dim for the packed parameter buffer

# Packed-parameter row layout (each weight block starts on an 8-row boundary).
R_W1 = (0, 32)        # Linear(32,16) weight, cols 0:16
R_WFA = (32, 48)      # features weight, classifier-output block (16,32), cols 0:32
R_WFB = (48, 54)      # features weight, md block (6,32),              cols 0:32
R_WC1 = (56, 88)      # concat hidden weight (32,16),                  cols 0:16
R_WC2 = (88, 104)     # head weight (16,3) zero-padded to (16,128),    cols 0:128
ROW_G1, ROW_BE1 = 104, 105     # BN(16)
ROW_GF, ROW_BEF = 106, 107     # BN(32)
ROW_GC1, ROW_BEC1 = 108, 109   # BN(16)
ROW_GC2, ROW_BEC2 = 110, 111   # BN(3) zero-padded to 128 lanes
P_ROWS = 112


def _bn_train(h, gamma, beta):
    """BatchNorm1d, training mode (batch mean, biased variance), one-pass statistics.

    var = E[h^2] - E[h]^2 makes the two XLU reductions independent (dual-issue) instead of
    serializing mean -> subtract -> square -> mean. Clamped at 0 against fp cancellation.
    gamma is folded into the rsqrt so each BN is one full-tile multiply + one add.
    """
    m = jnp.mean(h, axis=0, keepdims=True)
    msq = jnp.mean(h * h, axis=0, keepdims=True)
    var = jnp.maximum(msq - m * m, 0.0)
    s = gamma * jax.lax.rsqrt(var + EPS)          # (1, C) row: rsqrt on EUP, tiny VPU work
    return (h - m) * s + beta


def _dot_bf16(a, w):
    """MXU matmul with bf16 operands, f32 accumulation (single MXU pass on all chips)."""
    return jnp.dot(a.astype(jnp.bfloat16), w.astype(jnp.bfloat16),
                   preferred_element_type=jnp.float32)


def classifier_oct_kernel(z_ref, md_ref, p_ref, pred_ref):
    z = z_ref[...]                                  # (B, 32)
    md = md_ref[...]                                # (B, 6)

    # --- classifier(z): Linear -> BN -> ReLU  (bias cancels in training-mode BN) ---
    h = _dot_bf16(z, p_ref[R_W1[0]:R_W1[1], 0:C_OUT])
    h = _bn_train(h, p_ref[ROW_G1:ROW_G1 + 1, 0:C_OUT], p_ref[ROW_BE1:ROW_BE1 + 1, 0:C_OUT])
    h = jnp.maximum(h, 0.0)                         # prediction_fc

    # --- cat([prediction_fc, md], 1); rfeatures: Linear -> BN -> ReLU ---
    # cat followed by Linear == split matmul: [h | md] @ [[Wfa],[Wfb]] = h@Wfa + md@Wfb
    # (the md@Wfb term is data-independent of layer 1, so the scheduler overlaps it).
    h = (_dot_bf16(h, p_ref[R_WFA[0]:R_WFA[1], 0:F_OUT])
         + _dot_bf16(md, p_ref[R_WFB[0]:R_WFB[1], 0:F_OUT]))
    h = _bn_train(h, p_ref[ROW_GF:ROW_GF + 1, 0:F_OUT], p_ref[ROW_BEF:ROW_BEF + 1, 0:F_OUT])
    h = jnp.maximum(h, 0.0)

    # --- classifier_concat_layers hidden block: Linear -> BN -> ReLU ---
    h = _dot_bf16(h, p_ref[R_WC1[0]:R_WC1[1], 0:CC_OUT])
    h = _bn_train(h, p_ref[ROW_GC1:ROW_GC1 + 1, 0:CC_OUT], p_ref[ROW_BEC1:ROW_BEC1 + 1, 0:CC_OUT])
    h = jnp.maximum(h, 0.0)

    # --- head: Linear -> BN -> Sigmoid, computed lane-dense over 128 lanes ---
    # Weight/gamma/beta are zero beyond lane 3, so padded lanes are exactly 0 pre-sigmoid;
    # the store is a full unmasked [batch, 128] slab and the wrapper slices lanes [:3].
    h = _dot_bf16(h, p_ref[R_WC2[0]:R_WC2[1], :])
    h = _bn_train(h, p_ref[ROW_GC2:ROW_GC2 + 1, :], p_ref[ROW_BEC2:ROW_BEC2 + 1, :])
    pred_ref[...] = jax.nn.sigmoid(h)


def classifier_oct_forward(md, z, packed_params):
    """Returns (prediction, z), matching the PyTorch module's forward."""
    batch = z.shape[0]
    pred_padded = pl.pallas_call(
        classifier_oct_kernel,
        in_specs=[
            pl.BlockSpec(memory_space=pltpu.MemorySpace.VMEM),   # z  (B, 32)
            pl.BlockSpec(memory_space=pltpu.MemorySpace.VMEM),   # md (B, 6)
            pl.BlockSpec(memory_space=pltpu.MemorySpace.VMEM),   # packed params (112, 128)
        ],
        out_specs=pl.BlockSpec(memory_space=pltpu.MemorySpace.VMEM),
        out_shape=jax.ShapeDtypeStruct((batch, LANES), jnp.float32),
        cost_estimate=pl.CostEstimate(
            flops=2 * batch * (Z_DIM * C_OUT + C_OUT * F_OUT + MD_DIM * F_OUT
                               + F_OUT * CC_OUT + CC_OUT * LANES),
            transcendentals=4 * LANES + batch * LANES,   # rsqrt rows + sigmoid
            bytes_accessed=4 * (batch * Z_DIM + batch * MD_DIM
                                + P_ROWS * LANES + batch * LANES),
        ),
    )(z, md, packed_params)
    # Slice the 3 real head lanes (padded lanes hold sigmoid(0)=0.5 and are discarded).
    # If the downstream consumer can take the padded [batch,128] slab, return pred_padded
    # directly and fold this slice into its first op to save one XLA dispatch.
    return pred_padded[:, :HEAD], z


def init_params(key):
    """Deterministic synthetic init packed into one lane-padded [112, 128] f32 buffer.
    Linear weights ~ U(-1/sqrt(fan_in), 1/sqrt(fan_in)) (PyTorch default), pre-transposed to
    [in, out]; BatchNorm gamma=1, beta=0 (PyTorch default). Linear biases are omitted because
    they cancel exactly under the training-mode BatchNorm that follows every Linear.
    NOTE: this cancellation (and hence the bias omission) is only valid in training-mode BN;
    an .eval()-mode port with running statistics must reinstate the biases."""
    ks = jax.random.split(key, 4)

    def lin_w(k, fan_in, fan_out):
        bound = 1.0 / jnp.sqrt(fan_in)
        return jax.random.uniform(k, (fan_in, fan_out), jnp.float32, -bound, bound)

    w1 = lin_w(ks[0], Z_DIM, C_OUT)                       # Linear(32,16)
    wf = lin_w(ks[1], C_OUT + MD_DIM, F_OUT)              # Linear(22,32)
    wfa, wfb = wf[:C_OUT], wf[C_OUT:]                     # split for the folded torch.cat
    wc1 = lin_w(ks[2], F_OUT, CC_OUT)                     # Linear(32,16)
    wc2 = lin_w(ks[3], CC_OUT, HEAD)                      # Linear(16,3)

    p = jnp.zeros((P_ROWS, LANES), jnp.float32)
    p = p.at[R_W1[0]:R_W1[1], 0:C_OUT].set(w1)
    p = p.at[R_WFA[0]:R_WFA[1], 0:F_OUT].set(wfa)
    p = p.at[R_WFB[0]:R_WFB[1], 0:F_OUT].set(wfb)
    p = p.at[R_WC1[0]:R_WC1[1], 0:CC_OUT].set(wc1)
    p = p.at[R_WC2[0]:R_WC2[1], 0:HEAD].set(wc2)          # lanes 3..127 stay zero
    # BatchNorm affine params (gamma=1, beta=0); padded lanes keep gamma=0 -> exact 0 output.
    p = p.at[ROW_G1, 0:C_OUT].set(1.0)
    p = p.at[ROW_GF, 0:F_OUT].set(1.0)
    p = p.at[ROW_GC1, 0:CC_OUT].set(1.0)
    p = p.at[ROW_GC2, 0:HEAD].set(1.0)
    return p


if __name__ == "__main__":
    key = jax.random.PRNGKey(0)
    k_md, k_z, k_p = jax.random.split(key, 3)

    md = jax.random.normal(k_md, (BATCH, MD_DIM), jnp.float32)
    z = jax.random.normal(k_z, (BATCH, Z_DIM), jnp.float32)
    packed_params = init_params(k_p)

    prediction, z_out = jax.jit(classifier_oct_forward)(md, z, packed_params)
    jax.block_until_ready((prediction, z_out))

    assert prediction.shape == (BATCH, N_CLASSES - 1)
    assert z_out.shape == z.shape
    assert bool(jnp.all(jnp.isfinite(prediction)))
    assert bool(jnp.all((prediction >= 0.0) & (prediction <= 1.0)))
    print("KERNEL_OK")
</pallas_src>

<mosaic_0001>
module attributes {stable_mosaic.version = 11 : i64} {
  func.func @classifier_oct_kernel(%arg0: memref<8x32xf32, #tpu.memory_space<vmem>>, %arg1: memref<8x6xf32, #tpu.memory_space<vmem>>, %arg2: memref<112x128xf32, #tpu.memory_space<vmem>>, %arg3: memref<8x128xf32, #tpu.memory_space<vmem>>) attributes {dimension_semantics = [], scalar_prefetch = 0 : i64, scratch_operands = 0 : i64, tpu.core_type = #tpu.core_type<tc>} {
    %c0 = arith.constant 0 : index
    %c0_0 = arith.constant 0 : index
    %0 = vector.load %arg0[%c0, %c0_0] : memref<8x32xf32, #tpu.memory_space<vmem>>, vector<8x32xf32>
    %c0_1 = arith.constant 0 : index
    %c0_2 = arith.constant 0 : index
    %1 = vector.load %arg1[%c0_1, %c0_2] : memref<8x6xf32, #tpu.memory_space<vmem>>, vector<8x6xf32>
    %c0_3 = arith.constant 0 : index
    %c0_4 = arith.constant 0 : index
    %2 = vector.load %arg2[%c0_3, %c0_4] : memref<112x128xf32, #tpu.memory_space<vmem>>, vector<32x16xf32>
    %3 = arith.truncf %0 : vector<8x32xf32> to vector<8x32xbf16>
    %4 = arith.truncf %2 : vector<32x16xf32> to vector<32x16xbf16>
    %cst = arith.constant dense<0.000000e+00> : vector<8x16xf32>
    %5 = tpu.matmul %3, %4, %cst {dimension_numbers = #tpu.dot_dimension_numbers<[1], [0], [0], [1], [0, 0, 1, 1], [], []>} : vector<8x32xbf16>, vector<32x16xbf16>, vector<8x16xf32> -> vector<8x16xf32>
    %c104 = arith.constant 104 : index
    %c0_5 = arith.constant 0 : index
    %6 = vector.load %arg2[%c104, %c0_5] : memref<112x128xf32, #tpu.memory_space<vmem>>, vector<1x16xf32>
    %c105 = arith.constant 105 : index
    %c0_6 = arith.constant 0 : index
    %7 = vector.load %arg2[%c105, %c0_6] : memref<112x128xf32, #tpu.memory_space<vmem>>, vector<1x16xf32>
    %cst_7 = arith.constant dense<0.000000e+00> : vector<16xf32>
    %8 = vector.multi_reduction <add>, %5, %cst_7 [0] : vector<8x16xf32> to vector<16xf32>
    %9 = vector.shape_cast %8 : vector<16xf32> to vector<1x16xf32>
    %cst_8 = arith.constant 8.000000e+00 : f32
    %10 = vector.broadcast %cst_8 : f32 to vector<1x16xf32>
    %11 = arith.divf %9, %10 : vector<1x16xf32>
    %12 = arith.mulf %5, %5 : vector<8x16xf32>
    %cst_9 = arith.constant dense<0.000000e+00> : vector<16xf32>
    %13 = vector.multi_reduction <add>, %12, %cst_9 [0] : vector<8x16xf32> to vector<16xf32>
    %14 = vector.shape_cast %13 : vector<16xf32> to vector<1x16xf32>
    %cst_10 = arith.constant 8.000000e+00 : f32
    %15 = vector.broadcast %cst_10 : f32 to vector<1x16xf32>
    %16 = arith.divf %14, %15 : vector<1x16xf32>
    %17 = arith.mulf %11, %11 : vector<1x16xf32>
    %18 = arith.subf %16, %17 : vector<1x16xf32>
    %cst_11 = arith.constant 0.000000e+00 : f32
    %19 = vector.broadcast %cst_11 : f32 to vector<1x16xf32>
    %20 = arith.maximumf %18, %19 : vector<1x16xf32>
    %cst_12 = arith.constant 9.99999974E-6 : f32
    %21 = vector.broadcast %cst_12 : f32 to vector<1x16xf32>
    %22 = arith.addf %20, %21 : vector<1x16xf32>
    %23 = math.rsqrt %22 : vector<1x16xf32>
    %24 = arith.mulf %6, %23 : vector<1x16xf32>
    %25 = vector.broadcast %11 : vector<1x16xf32> to vector<8x16xf32>
    %26 = arith.subf %5, %25 : vector<8x16xf32>
    %27 = vector.broadcast %24 : vector<1x16xf32> to vector<8x16xf32>
    %28 = arith.mulf %26, %27 : vector<8x16xf32>
    %29 = vector.broadcast %7 : vector<1x16xf32> to vector<8x16xf32>
    %30 = arith.addf %28, %29 : vector<8x16xf32>
    %cst_13 = arith.constant 0.000000e+00 : f32
    %31 = vector.broadcast %cst_13 : f32 to vector<8x16xf32>
    %32 = arith.maximumf %30, %31 : vector<8x16xf32>
    %c32 = arith.constant 32 : index
    %c0_14 = arith.constant 0 : index
    %33 = vector.load %arg2[%c32, %c0_14] : memref<112x128xf32, #tpu.memory_space<vmem>>, vector<16x32xf32>
    %34 = arith.truncf %32 : vector<8x16xf32> to vector<8x16xbf16>
    %35 = arith.truncf %33 : vector<16x32xf32> to vector<16x32xbf16>
    %cst_15 = arith.constant dense<0.000000e+00> : vector<8x32xf32>
    %36 = tpu.matmul %34, %35, %cst_15 {dimension_numbers = #tpu.dot_dimension_numbers<[1], [0], [0], [1], [0, 0, 1, 1], [], []>} : vector<8x16xbf16>, vector<16x32xbf16>, vector<8x32xf32> -> vector<8x32xf32>
    %c48 = arith.constant 48 : index
    %c0_16 = arith.constant 0 : index
    %37 = vector.load %arg2[%c48, %c0_16] : memref<112x128xf32, #tpu.memory_space<vmem>>, vector<6x32xf32>
    %38 = arith.truncf %1 : vector<8x6xf32> to vector<8x6xbf16>
    %39 = arith.truncf %37 : vector<6x32xf32> to vector<6x32xbf16>
    %cst_17 = arith.constant dense<0.000000e+00> : vector<8x32xf32>
    %40 = tpu.matmul %38, %39, %cst_17 {dimension_numbers = #tpu.dot_dimension_numbers<[1], [0], [0], [1], [0, 0, 1, 1], [], []>} : vector<8x6xbf16>, vector<6x32xbf16>, vector<8x32xf32> -> vector<8x32xf32>
    %41 = arith.addf %36, %40 : vector<8x32xf32>
    %c106 = arith.constant 106 : index
    %c0_18 = arith.constant 0 : index
    %42 = vector.load %arg2[%c106, %c0_18] : memref<112x128xf32, #tpu.memory_space<vmem>>, vector<1x32xf32>
    %c107 = arith.constant 107 : index
    %c0_19 = arith.constant 0 : index
    %43 = vector.load %arg2[%c107, %c0_19] : memref<112x128xf32, #tpu.memory_space<vmem>>, vector<1x32xf32>
    %cst_20 = arith.constant dense<0.000000e+00> : vector<32xf32>
    %44 = vector.multi_reduction <add>, %41, %cst_20 [0] : vector<8x32xf32> to vector<32xf32>
    %45 = vector.shape_cast %44 : vector<32xf32> to vector<1x32xf32>
    %cst_21 = arith.constant 8.000000e+00 : f32
    %46 = vector.broadcast %cst_21 : f32 to vector<1x32xf32>
    %47 = arith.divf %45, %46 : vector<1x32xf32>
    %48 = arith.mulf %41, %41 : vector<8x32xf32>
    %cst_22 = arith.constant dense<0.000000e+00> : vector<32xf32>
    %49 = vector.multi_reduction <add>, %48, %cst_22 [0] : vector<8x32xf32> to vector<32xf32>
    %50 = vector.shape_cast %49 : vector<32xf32> to vector<1x32xf32>
    %cst_23 = arith.constant 8.000000e+00 : f32
    %51 = vector.broadcast %cst_23 : f32 to vector<1x32xf32>
    %52 = arith.divf %50, %51 : vector<1x32xf32>
    %53 = arith.mulf %47, %47 : vector<1x32xf32>
    %54 = arith.subf %52, %53 : vector<1x32xf32>
    %cst_24 = arith.constant 0.000000e+00 : f32
    %55 = vector.broadcast %cst_24 : f32 to vector<1x32xf32>
    %56 = arith.maximumf %54, %55 : vector<1x32xf32>
    %cst_25 = arith.constant 9.99999974E-6 : f32
    %57 = vector.broadcast %cst_25 : f32 to vector<1x32xf32>
    %58 = arith.addf %56, %57 : vector<1x32xf32>
    %59 = math.rsqrt %58 : vector<1x32xf32>
    %60 = arith.mulf %42, %59 : vector<1x32xf32>
    %61 = vector.broadcast %47 : vector<1x32xf32> to vector<8x32xf32>
    %62 = arith.subf %41, %61 : vector<8x32xf32>
    %63 = vector.broadcast %60 : vector<1x32xf32> to vector<8x32xf32>
    %64 = arith.mulf %62, %63 : vector<8x32xf32>
    %65 = vector.broadcast %43 : vector<1x32xf32> to vector<8x32xf32>
    %66 = arith.addf %64, %65 : vector<8x32xf32>
    %cst_26 = arith.constant 0.000000e+00 : f32
    %67 = vector.broadcast %cst_26 : f32 to vector<8x32xf32>
    %68 = arith.maximumf %66, %67 : vector<8x32xf32>
    %c56 = arith.constant 56 : index
    %c0_27 = arith.constant 0 : index
    %69 = vector.load %arg2[%c56, %c0_27] : memref<112x128xf32, #tpu.memory_space<vmem>>, vector<32x16xf32>
    %70 = arith.truncf %68 : vector<8x32xf32> to vector<8x32xbf16>
    %71 = arith.truncf %69 : vector<32x16xf32> to vector<32x16xbf16>
    %cst_28 = arith.constant dense<0.000000e+00> : vector<8x16xf32>
    %72 = tpu.matmul %70, %71, %cst_28 {dimension_numbers = #tpu.dot_dimension_numbers<[1], [0], [0], [1], [0, 0, 1, 1], [], []>} : vector<8x32xbf16>, vector<32x16xbf16>, vector<8x16xf32> -> vector<8x16xf32>
    %c108 = arith.constant 108 : index
    %c0_29 = arith.constant 0 : index
    %73 = vector.load %arg2[%c108, %c0_29] : memref<112x128xf32, #tpu.memory_space<vmem>>, vector<1x16xf32>
    %c109 = arith.constant 109 : index
    %c0_30 = arith.constant 0 : index
    %74 = vector.load %arg2[%c109, %c0_30] : memref<112x128xf32, #tpu.memory_space<vmem>>, vector<1x16xf32>
    %cst_31 = arith.constant dense<0.000000e+00> : vector<16xf32>
    %75 = vector.multi_reduction <add>, %72, %cst_31 [0] : vector<8x16xf32> to vector<16xf32>
    %76 = vector.shape_cast %75 : vector<16xf32> to vector<1x16xf32>
    %cst_32 = arith.constant 8.000000e+00 : f32
    %77 = vector.broadcast %cst_32 : f32 to vector<1x16xf32>
    %78 = arith.divf %76, %77 : vector<1x16xf32>
    %79 = arith.mulf %72, %72 : vector<8x16xf32>
    %cst_33 = arith.constant dense<0.000000e+00> : vector<16xf32>
    %80 = vector.multi_reduction <add>, %79, %cst_33 [0] : vector<8x16xf32> to vector<16xf32>
    %81 = vector.shape_cast %80 : vector<16xf32> to vector<1x16xf32>
    %cst_34 = arith.constant 8.000000e+00 : f32
    %82 = vector.broadcast %cst_34 : f32 to vector<1x16xf32>
    %83 = arith.divf %81, %82 : vector<1x16xf32>
    %84 = arith.mulf %78, %78 : vector<1x16xf32>
    %85 = arith.subf %83, %84 : vector<1x16xf32>
    %cst_35 = arith.constant 0.000000e+00 : f32
    %86 = vector.broadcast %cst_35 : f32 to vector<1x16xf32>
    %87 = arith.maximumf %85, %86 : vector<1x16xf32>
    %cst_36 = arith.constant 9.99999974E-6 : f32
    %88 = vector.broadcast %cst_36 : f32 to vector<1x16xf32>
    %89 = arith.addf %87, %88 : vector<1x16xf32>
    %90 = math.rsqrt %89 : vector<1x16xf32>
    %91 = arith.mulf %73, %90 : vector<1x16xf32>
    %92 = vector.broadcast %78 : vector<1x16xf32> to vector<8x16xf32>
    %93 = arith.subf %72, %92 : vector<8x16xf32>
    %94 = vector.broadcast %91 : vector<1x16xf32> to vector<8x16xf32>
    %95 = arith.mulf %93, %94 : vector<8x16xf32>
    %96 = vector.broadcast %74 : vector<1x16xf32> to vector<8x16xf32>
    %97 = arith.addf %95, %96 : vector<8x16xf32>
    %cst_37 = arith.constant 0.000000e+00 : f32
    %98 = vector.broadcast %cst_37 : f32 to vector<8x16xf32>
    %99 = arith.maximumf %97, %98 : vector<8x16xf32>
    %c88 = arith.constant 88 : index
    %c0_38 = arith.constant 0 : index
    %100 = vector.load %arg2[%c88, %c0_38] : memref<112x128xf32, #tpu.memory_space<vmem>>, vector<16x128xf32>
    %101 = arith.truncf %99 : vector<8x16xf32> to vector<8x16xbf16>
    %102 = arith.truncf %100 : vector<16x128xf32> to vector<16x128xbf16>
    %cst_39 = arith.constant dense<0.000000e+00> : vector<8x128xf32>
    %103 = tpu.matmul %101, %102, %cst_39 {dimension_numbers = #tpu.dot_dimension_numbers<[1], [0], [0], [1], [0, 0, 1, 1], [], []>} : vector<8x16xbf16>, vector<16x128xbf16>, vector<8x128xf32> -> vector<8x128xf32>
    %c110 = arith.constant 110 : index
    %c0_40 = arith.constant 0 : index
    %104 = vector.load %arg2[%c110, %c0_40] : memref<112x128xf32, #tpu.memory_space<vmem>>, vector<1x128xf32>
    %c111 = arith.constant 111 : index
    %c0_41 = arith.constant 0 : index
    %105 = vector.load %arg2[%c111, %c0_41] : memref<112x128xf32, #tpu.memory_space<vmem>>, vector<1x128xf32>
    %cst_42 = arith.constant dense<0.000000e+00> : vector<128xf32>
    %106 = vector.multi_reduction <add>, %103, %cst_42 [0] : vector<8x128xf32> to vector<128xf32>
    %107 = vector.shape_cast %106 : vector<128xf32> to vector<1x128xf32>
    %cst_43 = arith.constant 8.000000e+00 : f32
    %108 = vector.broadcast %cst_43 : f32 to vector<1x128xf32>
    %109 = arith.divf %107, %108 : vector<1x128xf32>
    %110 = arith.mulf %103, %103 : vector<8x128xf32>
    %cst_44 = arith.constant dense<0.000000e+00> : vector<128xf32>
    %111 = vector.multi_reduction <add>, %110, %cst_44 [0] : vector<8x128xf32> to vector<128xf32>
    %112 = vector.shape_cast %111 : vector<128xf32> to vector<1x128xf32>
    %cst_45 = arith.constant 8.000000e+00 : f32
    %113 = vector.broadcast %cst_45 : f32 to vector<1x128xf32>
    %114 = arith.divf %112, %113 : vector<1x128xf32>
    %115 = arith.mulf %109, %109 : vector<1x128xf32>
    %116 = arith.subf %114, %115 : vector<1x128xf32>
    %cst_46 = arith.constant 0.000000e+00 : f32
    %117 = vector.broadcast %cst_46 : f32 to vector<1x128xf32>
    %118 = arith.maximumf %116, %117 : vector<1x128xf32>
    %cst_47 = arith.constant 9.99999974E-6 : f32
    %119 = vector.broadcast %cst_47 : f32 to vector<1x128xf32>
    %120 = arith.addf %118, %119 : vector<1x128xf32>
    %121 = math.rsqrt %120 : vector<1x128xf32>
    %122 = arith.mulf %104, %121 : vector<1x128xf32>
    %123 = vector.broadcast %109 : vector<1x128xf32> to vector<8x128xf32>
    %124 = arith.subf %103, %123 : vector<8x128xf32>
    %125 = vector.broadcast %122 : vector<1x128xf32> to vector<8x128xf32>
    %126 = arith.mulf %124, %125 : vector<8x128xf32>
    %127 = vector.broadcast %105 : vector<1x128xf32> to vector<8x128xf32>
    %128 = arith.addf %126, %127 : vector<8x128xf32>
    %129 = arith.negf %128 : vector<8x128xf32>
    %130 = math.exp %129 : vector<8x128xf32>
    %cst_48 = arith.constant 1.000000e+00 : f32
    %131 = vector.broadcast %cst_48 : f32 to vector<8x128xf32>
    %132 = arith.addf %131, %130 : vector<8x128xf32>
    %133 = arith.divf %131, %132 : vector<8x128xf32>
    %c0_49 = arith.constant 0 : index
    %c0_50 = arith.constant 0 : index
    %134 = vector.load %arg3[%c0_49, %c0_50] : memref<8x128xf32, #tpu.memory_space<vmem>>, vector<8x128xf32>
    tpu.vector_store %arg3[%c0_49, %c0_50], %133 {strides = array<i32>} : memref<8x128xf32, #tpu.memory_space<vmem>>, vector<8x128xf32>,
    return
  }
}

</mosaic_0001>

<bundles_post_ra>
// kernel: classifier_oct_forward.1
= control target key start
LH: loop header
LB: loop body
LE: loop exit
PB: predicated region body
PF: predicated region fallthrough
CT: control target
= control target key end

     0   :  { %8 = vsyncpa [#allocation3], 0  ;;  %s526_s0 = inlined_call_operand.hbm [shape: f32[8,32], index: 0, kind: input, shape index: {}]   ;;  %s527_s1 = inlined_call_operand.hbm [shape: f32[8,6], index: 1, kind: input, shape index: {}]   ;;  %s528_s2 = inlined_call_operand.hbm [shape: f32[112,128], index: 2, kind: input, shape index: {}]   ;;  %s529_s3 = inlined_call_operand.vmem [shape: f32[8,128], index: 3, kind: output, shape index: {}]  }
   0x1   :  { %9 = vsyncpa [#allocation5], 0  ;;  %s26_s14 = sshll.u32 %s527_s1, 4  ;;  %s468_s15 = smov [#allocation4]   ;;  %s27_s14 = int_to_ptr.hbm [resolvable:$true] %s26_s14 }
   0x2   :  { %s28_s16 = sshll.u32 %s468_s15, 4  ;;  %s15_s19 = sshll.u32 %s526_s0, 4  ;;  %s29_s16 = int_to_ptr.vmem [resolvable:$true] %s28_s16  ;;  %s16_s19 = int_to_ptr.hbm [resolvable:$true] %s15_s19 }
   0x3   :  { %31 = dma.hbm_to_vmem [thread:$0]  %s27_s14, 128, %s29_s16, [#allocation5]  }
   0x4   :  { %s469_s20 = smov [#allocation2]   ;;  %s36_s24 = sshll.u32 %s528_s2, 4  ;;  %s37_s24 = int_to_ptr.hbm [resolvable:$true] %s36_s24 }
   0x5   :  { %s17_s21 = sshll.u32 %s469_s20, 4  ;;  %s470_s1 = smov [#allocation6]   ;;  %s18_s21 = int_to_ptr.vmem [resolvable:$true] %s17_s21 }
   0x6   :  { %20 = dma.hbm_to_vmem [thread:$0]  %s16_s19, 128, %s18_s21, [#allocation3]  }
   0x7   :  { %s38_s25 = sshll.u32 %s470_s1, 4  ;;  %s471_s26 = smov 128   ;;  %s39_s25 = int_to_ptr.vmem [resolvable:$true] %s38_s25 }
   0x8   :  { %s472_s27 = smov 8  }
   0x9   :  { %44 = dma.hbm_to_vmem [thread:$0]  %s37_s24, 1792, %s39_s25, [#allocation5], %s471_s26, %s471_s26, %s472_s27  }
   0xa   :  { %464 = dma.done.wait [#allocation3], 128  }
   0xb   :  { %465 = vsyncadd [#allocation3], 4294967168 }
   0xc   :  { %466 = dma.done.wait [#allocation5], 1920  }
   0xd   :  { %467 = vsyncadd [#allocation5], 4294965376  ;;  %v62_v0 = vld [vmem:[#allocation6 + $0x10] sm:$0xff]  ;;  %v63_v1 = vld [vmem:[#allocation6 + $0x18] sm:$0xff]  ;;  %vm67_vm0 = vcmask 261120   ;;  %v473_v8 = vmov 8.0  }
   0xe   :  { %v60_v2 = vld [vmem:[#allocation6] sm:$0xff]  ;;  %v66_v3 = vpack.c.bf16 %v63_v1, %v62_v0  ;;  %v61_v4 = vld [vmem:[#allocation6 + $0x8] sm:$0xff]  ;;  %v58_v6 = vld [vmem:[#allocation2] sm:$0xff]  ;;  %378 = vrcp.f32 %v473_v8  ;;  %vm86_vm1 = vcmask 130048   ;;  %vm143_vm3 = vcmask 1042432  }
   0xf   :  { %v65_v5 = vpack.c.bf16 %v61_v4, %v60_v2  ;;  %v64_v7 = vpack.c.bf16 %v58_v6, %v58_v6  ;;  %v136_v31 = vld [vmem:[#allocation6 + $0x30] sm:$0x3f]  ;;  %v132_v35 = vld [vmem:[#allocation6 + $0x20] sm:$0xff]  ;;  %v133_v36 = vld [vmem:[#allocation6 + $0x28] sm:$0xff]  ;;  %vm139_vm4 = vcmask 48128  }
  0x10   :  { %77 = vmatpush.bf16.msra.mxu0 %v66_v3  ;;  %v138_v34 = vpack.c.bf16 %v136_v31, %v136_v31  ;;  %v59_v37 = vld [vmem:[#allocation4] sm:$0xff]  ;;  %v135_v38 = vpack.c.bf16 %v133_v36, %v132_v35  ;;  %v84_v51 = vld [vmem:[#allocation6 + $0x68] sm:$0x1]  ;;  %v374_v57 = vld [vmem:[#allocation6 + $0x69] ss:$0 sm:$0xff] }
  0x11   :  { %v137_v42 = vpack.c.bf16 %v59_v37, %v59_v37  ;;  %v218_v2 = vld [vmem:[#allocation6 + $0x48] sm:$0xff]  ;;  %v219_v3 = vld [vmem:[#allocation6 + $0x50] sm:$0xff]  ;;  %v216_v4 = vld [vmem:[#allocation6 + $0x38] sm:$0xff] }
  0x12   :  { %v145_v41 = vsel %vm143_vm3, %v138_v34, 0  ;;  %170 = vmatpush.bf16.msra.mxu2 %v135_v38  ;;  %v217_v6 = vld [vmem:[#allocation6 + $0x40] sm:$0xff]  ;;  %v176_v36 = vld [vmem:[#allocation6 + $0x6a] sm:$0x1] }
  0x13   :  { %154 = vmatpush.bf16.msra.mxu1 %v145_v41 }
  0x14   :  { %78 = vmatpush.bf16.msra.mxu0 %v65_v5  ;;  %v379_v9 = vpop.eup %378  ;;  %v222_v5 = vpack.c.bf16 %v219_v3, %v218_v2  ;;  %v279_v3 = vld [vmem:[#allocation6 + $0x58] sm:$0xff] }
  0x15   :  { %v95_v10 = vmul.f32 8.0, %v379_v9  ;;  %vm99_vm2 = vweird.f32 %v379_v9 }
  0x16   :  { %363 = vmatmul.msk.bf16.vlgmr.msra.gmra.mxu1 %vm139_vm4, %v137_v42  ;;  %232 = vmatpush.bf16.msra.mxu3 %v222_v5  ;;  %v375_v42 = vld [vmem:[#allocation6 + $0x6b] ss:$0 sm:$0xff] }
  0x17   :  { %362 = vmatmul.msk.bf16.vlgmr.msra.gmra.mxu0 %vm67_vm0, %v64_v7  ;;  %v96_v11 = vsub.f32 1.0, %v95_v10  ;;  %v221_v10 = vpack.c.bf16 %v217_v6, %v216_v4  ;;  %v280_v4 = vld [vmem:[#allocation6 + $0x60] sm:$0xff] }
  0x18   :  { %v282_v5 = vpack.c.bf16 %v280_v4, %v279_v3 }
  0x19   :  { %v97_v16 = vmul.f32 %v379_v9, %v96_v11 }
  0x1a   :  { %233 = vmatpush.bf16.msra.mxu3 %v221_v10  ;;  %293 = vmatpush.bf16.msrb.mxu1 %v282_v5 }
  0x1b   :  { %v98_v22 = vadd.f32 %v379_v9, %v97_v16 }
  0x1d   :  { %v506_v28 = vsel %vm99_vm2, %v379_v9, %v98_v22 }
  0x93   :  { %v156_v62 = vpop.f32.mrf.mxu1 }
  0x94   :  { %v80_v12 = vpop.f32.mrf.mxu0 }
  0x95   :  { %v87_v13 = vsel %vm86_vm1, %v80_v12, 0.0  ;;  %v102_v14 = vmul.f32 %v80_v12, %v80_v12 }
  0x96   :  { %v88_v15 = vrot.slane %v87_v13, 4 }
  0x97   :  { %v103_v17 = vsel %vm86_vm1, %v102_v14, 0.0 }
  0x98   :  { %v89_v18 = vadd.f32 %v88_v15, %v87_v13  ;;  %v104_v19 = vrot.slane %v103_v17, 4 }
  0x9a   :  { %v90_v20 = vrot.slane %v89_v18, 2  ;;  %v105_v21 = vadd.f32 %v104_v19, %v103_v17 }
  0x9b   :  { %v158_v63 = vpop.f32.mrf.mxu1 }
  0x9c   :  { %v91_v23 = vadd.f32 %v90_v20, %v89_v18  ;;  %v106_v24 = vrot.slane %v105_v21, 2  ;;  %v82_v25 = vpop.f32.mrf.mxu0 }
  0x9e   :  { %v92_v26 = vrot.slane %v91_v23, 1  ;;  %v107_v27 = vadd.f32 %v106_v24, %v105_v21 }
  0xa0   :  { %v93_v29 = vadd.f32 %v92_v26, %v91_v23  ;;  %v108_v30 = vrot.slane %v107_v27, 1 }
  0xa2   :  { %v101_v32 = vmul.f32 %v506_v28, %v93_v29  ;;  %v109_v33 = vadd.f32 %v108_v30, %v107_v27 }
  0xa4   :  { %v110_v39 = vmul.f32 %v109_v33, %v506_v28  ;;  %v111_v40 = vmul.f32 %v101_v32, %v101_v32  ;;  %v126_v55 = vsub.f32 %v80_v12, %v101_v32 }
  0xa6   :  { %v112_v43 = vsub.f32 %v110_v39, %v111_v40 }
  0xa8   :  { %v113_v44 = vmax.f32 %v112_v43, 0.0 }
  0xaa   :  { %v114_v45 = vadd.f32 1e-05, %v113_v44 }
  0xac   :  { %380 = vrsqrt.f32 %v114_v45  ;;  %vm121_vm6 = vweird.f32 %v114_v45 }
  0xb2   :  { %v381_v46 = vpop.eup %380 }
  0xb3   :  { %v116_v47 = vmul.f32 %v381_v46, %v114_v45  ;;  %vm122_vm5 = vweird.f32 %v381_v46 }
  0xb4   :  { %vm123_vm7 = vmor %vm121_vm6, %vm122_vm5 }
  0xb5   :  { %v117_v48 = vmul.f32 %v381_v46, %v116_v47 }
  0xb7   :  { %v118_v49 = vmul.f32 0.5, %v117_v48 }
  0xb9   :  { %v119_v50 = vsub.f32 1.5, %v118_v49 }
  0xbb   :  { %v120_v52 = vmul.f32 %v381_v46, %v119_v50 }
  0xbd   :  { %v124_v53 = vsel %vm123_vm7, %v381_v46, %v120_v52 }
  0xbe   :  { %v125_v54 = vmul.f32 %v124_v53, %v84_v51 }
  0xc0   :  { %v127_v56 = vperm.slane %v125_v54, 0 }
  0xc2   :  { %v128_v58 = vmul.f32 %v127_v56, %v126_v55 }
  0xc4   :  { %v130_v59 = vadd.f32 %v374_v57, %v128_v58 }
  0xc6   :  { %v131_v60 = vmax.f32 %v130_v59, 0.0 }
  0xc8   :  { %v134_v61 = vpack.c.bf16 %v131_v60, %v131_v60 }
  0xca   :  { %364 = vmatmul.msk.bf16.vlgmr.msra.gmra.mxu2 %vm86_vm1, %v134_v61 }
 0x14d   :  { %v172_v0 = vpop.f32.mrf.mxu2 }
 0x14e   :  { %v173_v1 = vadd.f32 %v172_v0, %v156_v62 }
 0x150   :  { %v178_v7 = vsel %vm67_vm0, %v173_v1, 0.0  ;;  %v186_v8 = vmul.f32 %v173_v1, %v173_v1 }
 0x151   :  { %v179_v9 = vrot.slane %v178_v7, 4 }
 0x152   :  { %v187_v11 = vsel %vm67_vm0, %v186_v8, 0.0 }
 0x153   :  { %v180_v12 = vadd.f32 %v179_v9, %v178_v7  ;;  %v188_v13 = vrot.slane %v187_v11, 4 }
 0x155   :  { %v181_v14 = vrot.slane %v180_v12, 2  ;;  %v189_v15 = vadd.f32 %v188_v13, %v187_v11  ;;  %v174_v16 = vpop.f32.mrf.mxu2 }
 0x157   :  { %v182_v17 = vadd.f32 %v181_v14, %v180_v12  ;;  %v190_v18 = vrot.slane %v189_v15, 2  ;;  %v239_v14 = vld [vmem:[#allocation6 + $0x6c] sm:$0x1] }
 0x159   :  { %v183_v19 = vrot.slane %v182_v17, 1  ;;  %v191_v20 = vadd.f32 %v190_v18, %v189_v15 }
 0x15b   :  { %v184_v21 = vadd.f32 %v183_v19, %v182_v17  ;;  %v192_v22 = vrot.slane %v191_v20, 1 }
 0x15d   :  { %v185_v23 = vmul.f32 %v184_v21, %v506_v28  ;;  %v193_v24 = vadd.f32 %v192_v22, %v191_v20  ;;  %v376_v20 = vld [vmem:[#allocation6 + $0x6d] ss:$0 sm:$0xff] }
 0x15f   :  { %v194_v25 = vmul.f32 %v193_v24, %v506_v28  ;;  %v195_v26 = vmul.f32 %v185_v23, %v185_v23  ;;  %v210_v40 = vsub.f32 %v173_v1, %v185_v23 }
 0x161   :  { %v196_v27 = vsub.f32 %v194_v25, %v195_v26 }
 0x163   :  { %v197_v29 = vmax.f32 %v196_v27, 0.0 }
 0x165   :  { %v198_v30 = vadd.f32 1e-05, %v197_v29 }
 0x167   :  { %382 = vrsqrt.f32 %v198_v30  ;;  %vm205_vm9 = vweird.f32 %v198_v30 }
 0x16d   :  { %v383_v31 = vpop.eup %382 }
 0x16e   :  { %v200_v32 = vmul.f32 %v383_v31, %v198_v30  ;;  %vm206_vm8 = vweird.f32 %v383_v31 }
 0x16f   :  { %vm207_vm10 = vmor %vm205_vm9, %vm206_vm8 }
 0x170   :  { %v201_v33 = vmul.f32 %v383_v31, %v200_v32 }
 0x172   :  { %v202_v34 = vmul.f32 0.5, %v201_v33 }
 0x174   :  { %v203_v35 = vsub.f32 1.5, %v202_v34 }
 0x176   :  { %v204_v37 = vmul.f32 %v383_v31, %v203_v35 }
 0x178   :  { %v208_v38 = vsel %vm207_vm10, %v383_v31, %v204_v37 }
 0x179   :  { %v209_v39 = vmul.f32 %v208_v38, %v176_v36 }
 0x17b   :  { %v211_v41 = vperm.slane %v209_v39, 0 }
 0x17d   :  { %v212_v43 = vmul.f32 %v211_v41, %v210_v40 }
 0x17f   :  { %v214_v44 = vadd.f32 %v375_v42, %v212_v43 }
 0x181   :  { %v215_v45 = vmax.f32 %v214_v44, 0.0 }
 0x183   :  { %v220_v46 = vpack.c.bf16 %v215_v45, %v215_v45 }
 0x185   :  { %365 = vmatmul.msk.bf16.vlgmr.msra.gmra.mxu3 %vm67_vm0, %v220_v46 }
 0x208   :  { %v235_v47 = vpop.f32.mrf.mxu3 }
 0x209   :  { %v241_v48 = vsel %vm86_vm1, %v235_v47, 0.0  ;;  %v249_v49 = vmul.f32 %v235_v47, %v235_v47 }
 0x20a   :  { %v242_v50 = vrot.slane %v241_v48, 4 }
 0x20b   :  { %v250_v51 = vsel %vm86_vm1, %v249_v49, 0.0 }
 0x20c   :  { %v243_v52 = vadd.f32 %v242_v50, %v241_v48  ;;  %v251_v53 = vrot.slane %v250_v51, 4 }
 0x20e   :  { %v244_v54 = vrot.slane %v243_v52, 2  ;;  %v252_v55 = vadd.f32 %v251_v53, %v250_v51 }
 0x210   :  { %v245_v56 = vadd.f32 %v244_v54, %v243_v52  ;;  %v253_v57 = vrot.slane %v252_v55, 2  ;;  %v237_v58 = vpop.f32.mrf.mxu3  ;;  %v299_v52 = vld [vmem:[#allocation6 + $0x6e] sm:$0x1] }
 0x212   :  { %v246_v59 = vrot.slane %v245_v56, 1  ;;  %v254_v60 = vadd.f32 %v253_v57, %v252_v55 }
 0x214   :  { %v247_v61 = vadd.f32 %v246_v59, %v245_v56  ;;  %v255_v62 = vrot.slane %v254_v60, 1 }
 0x216   :  { %v248_v63 = vmul.f32 %v247_v61, %v506_v28  ;;  %v256_v0 = vadd.f32 %v255_v62, %v254_v60 }
 0x218   :  { %v257_v1 = vmul.f32 %v256_v0, %v506_v28  ;;  %v258_v2 = vmul.f32 %v248_v63, %v248_v63  ;;  %v273_v18 = vsub.f32 %v235_v47, %v248_v63 }
 0x21a   :  { %v259_v6 = vsub.f32 %v257_v1, %v258_v2 }
 0x21c   :  { %v260_v7 = vmax.f32 %v259_v6, 0.0 }
 0x21e   :  { %v261_v8 = vadd.f32 1e-05, %v260_v7 }
 0x220   :  { %384 = vrsqrt.f32 %v261_v8  ;;  %vm268_vm12 = vweird.f32 %v261_v8 }
 0x226   :  { %v385_v9 = vpop.eup %384 }
 0x227   :  { %v263_v10 = vmul.f32 %v385_v9, %v261_v8  ;;  %vm269_vm11 = vweird.f32 %v385_v9 }
 0x228   :  { %vm270_vm13 = vmor %vm268_vm12, %vm269_vm11 }
 0x229   :  { %v264_v11 = vmul.f32 %v385_v9, %v263_v10 }
 0x22b   :  { %v265_v12 = vmul.f32 0.5, %v264_v11 }
 0x22d   :  { %v266_v13 = vsub.f32 1.5, %v265_v12 }
 0x22f   :  { %v267_v15 = vmul.f32 %v385_v9, %v266_v13 }
 0x231   :  { %v271_v16 = vsel %vm270_vm13, %v385_v9, %v267_v15 }
 0x232   :  { %v272_v17 = vmul.f32 %v271_v16, %v239_v14 }
 0x234   :  { %v274_v19 = vperm.slane %v272_v17, 0 }
 0x236   :  { %v275_v21 = vmul.f32 %v274_v19, %v273_v18 }
 0x238   :  { %v277_v22 = vadd.f32 %v376_v20, %v275_v21 }
 0x23a   :  { %v278_v23 = vmax.f32 %v277_v22, 0.0 }
 0x23c   :  { %v281_v24 = vpack.c.bf16 %v278_v23, %v278_v23 }
 0x23e   :  { %366 = vmatmul.msk.bf16.vlgmr.msrb.gmra.mxu1 %vm86_vm1, %v281_v24 }
 0x2bb   :  { %v295_v25 = vpop.f32.mrf.mxu1 }
 0x2bc   :  { %v301_v26 = vrot.slane %v295_v25, 4  ;;  %v308_v27 = vmul.f32 %v295_v25, %v295_v25 }
 0x2be   :  { %v302_v29 = vadd.f32 %v301_v26, %v295_v25  ;;  %v309_v30 = vrot.slane %v308_v27, 4 }
 0x2c0   :  { %v303_v31 = vrot.slane %v302_v29, 2  ;;  %v310_v32 = vadd.f32 %v309_v30, %v308_v27 }
 0x2c2   :  { %v304_v33 = vadd.f32 %v303_v31, %v302_v29  ;;  %v311_v34 = vrot.slane %v310_v32, 2 }
 0x2c3   :  { %v297_v35 = vpop.f32.mrf.mxu1 }
 0x2c4   :  { %v305_v36 = vrot.slane %v304_v33, 1  ;;  %v312_v37 = vadd.f32 %v311_v34, %v310_v32 }
 0x2c6   :  { %v306_v38 = vadd.f32 %v305_v36, %v304_v33  ;;  %v313_v39 = vrot.slane %v312_v37, 1 }
 0x2c8   :  { %v307_v40 = vmul.f32 %v306_v38, %v506_v28  ;;  %v314_v41 = vadd.f32 %v313_v39, %v312_v37 }
 0x2ca   :  { %v315_v42 = vmul.f32 %v314_v41, %v506_v28  ;;  %v316_v43 = vmul.f32 %v307_v40, %v307_v40  ;;  %v331_v56 = vsub.f32 %v295_v25, %v307_v40  ;;  %v377_v28 = vld [vmem:[#allocation6 + $0x6f] ss:$0 sm:$0xff] }
 0x2cc   :  { %v317_v44 = vsub.f32 %v315_v42, %v316_v43 }
 0x2ce   :  { %v318_v45 = vmax.f32 %v317_v44, 0.0 }
 0x2d0   :  { %v319_v46 = vadd.f32 1e-05, %v318_v45 }
 0x2d2   :  { %386 = vrsqrt.f32 %v319_v46  ;;  %vm326_vm15 = vweird.f32 %v319_v46 }
 0x2d8   :  { %v387_v47 = vpop.eup %386 }
 0x2d9   :  { %v321_v48 = vmul.f32 %v387_v47, %v319_v46  ;;  %vm327_vm14 = vweird.f32 %v387_v47 }
 0x2da   :  { %vm328_vm0 = vmor %vm326_vm15, %vm327_vm14 }
 0x2db   :  { %v322_v49 = vmul.f32 %v387_v47, %v321_v48 }
 0x2dd   :  { %v323_v50 = vmul.f32 0.5, %v322_v49 }
 0x2df   :  { %v324_v51 = vsub.f32 1.5, %v323_v50 }
 0x2e1   :  { %v325_v53 = vmul.f32 %v387_v47, %v324_v51 }
 0x2e3   :  { %v329_v54 = vsel %vm328_vm0, %v387_v47, %v325_v53 }
 0x2e4   :  { %v330_v55 = vmul.f32 %v329_v54, %v299_v52 }
 0x2e6   :  { %v332_v57 = vperm.slane %v330_v55, 0 }
 0x2e8   :  { %v333_v58 = vmul.f32 %v332_v57, %v331_v56 }
 0x2ea   :  { %v335_v59 = vadd.f32 %v377_v28, %v333_v58 }
 0x2ec   :  { %v367_v60 = vmul.f32 -1.442695, %v335_v59 }
 0x2ee   :  { %388 = vpow2.f32 %v367_v60 }
 0x2f4   :  { %v389_v61 = vpop.eup %388 }
 0x2f5   :  { %v339_v62 = vadd.f32 1.0, %v389_v61 }
 0x2f7   :  { %390 = vrcp.f32 %v339_v62  ;;  %v351_v2 = vand.u32 2147483648, %v339_v62  ;;  %v349_v4 = vand.u32 2147483647, %v339_v62  ;;  %vm345_vm2 = vweird.f32 %v339_v62 }
 0x2f9   :  { %v352_v6 = vor.u32 1.1754944e-38, %v351_v2  ;;  %vm350_vm4 = vcmp.eq.f32.partialorder %v349_v4, 8.507059e+37 }
 0x2fd   :  { %v391_v63 = vpop.eup %390 }
 0x2fe   :  { %v341_v0 = vmul.f32 %v391_v63, %v339_v62  ;;  %vm346_vm1 = vweird.f32 %v391_v63 }
 0x2ff   :  { %vm347_vm3 = vmor %vm345_vm2, %vm346_vm1 }
 0x300   :  { %v342_v1 = vsub.f32 1.0, %v341_v0 }
 0x302   :  { %v343_v3 = vmul.f32 %v391_v63, %v342_v1 }
 0x304   :  { %v344_v5 = vadd.f32 %v391_v63, %v343_v3 }
 0x306   :  { %v348_v7 = vsel %vm347_vm3, %v391_v63, %v344_v5 }
 0x307   :  { %v353_v8 = vsel %vm350_vm4, %v352_v6, %v348_v7 }
 0x308   :  { %355 = vst [vmem:[%s529_s3] sm:$0xff] %v353_v8 }
 0x309   :  { %360 = vsyncpa [#allocation3], 1 }
 0x30a   :  { %361 = vsyncpa [#allocation5], 1 }

</bundles_post_ra>
